<compile_context>
chip_gen: v7x
topology: tpu7x:2x2x1
jax: 0.10.0
libtpu: 0.0.40
codegen_flags: <defaults>
</compile_context>

<pallas_src>
import jax
import jax.numpy as jnp
from jax.experimental import pallas as pl
from jax.experimental.pallas import tpu as pltpu

PACK = 8  # batch rows packed per lane slab (8 * act_dim = 128 lanes for act_dim=16)


def mask_mlp_kernel(x_ref, w1_ref, b1_ref, w2_ref, b2_ref, o_ref):
    # Two MXU matmuls on bf16 operands with f32 accumulation; all elementwise
    # math (bias, ReLU, sigmoid, log) stays in f32.
    x = x_ref[...]                                                       # (TR, P*obs) bf16
    h = jnp.dot(x, w1_ref[...], preferred_element_type=jnp.float32)     # (TR, P*64) f32
    h = jnp.maximum(h + b1_ref[...], 0.0)                                # bias + ReLU (f32)
    h = h.astype(jnp.bfloat16)
    logits = jnp.dot(h, w2_ref[...], preferred_element_type=jnp.float32)  # (TR, P*act) f32
    logits = logits + b2_ref[...]
    probs = jax.nn.sigmoid(logits)
    o_ref[...] = jnp.log(probs + 1e-9)   # matches the PyTorch log(sigmoid(.) + 1e-9) contract


def _round_up(n, m):
    return ((n + m - 1) // m) * m


def mask_model_forward(x, w1, b1, w2, b2, *, batch_tile=1024,
                       compute_dtype=jnp.bfloat16):
    """log(sigmoid(MLP(x)) + 1e-9) with a lane-packed Pallas TPU kernel."""
    B, obs_dim = x.shape
    hidden = w1.shape[1]
    act_dim = w2.shape[1]
    P = PACK

    b1 = b1.reshape(1, hidden).astype(jnp.float32)
    b2 = b2.reshape(1, act_dim).astype(jnp.float32)

    # ---- choose the packed-row tile (sublane aligned, pipelined grid) -------
    rows = _round_up(B, P) // P                # packed slab rows needed
    tr = max(1, batch_tile // P)               # packed rows per grid step
    if tr >= rows:
        tr = rows                              # single block (full-dim, no align needed)
    else:
        tr = max(16, (tr // 16) * 16)          # 16-row align (bf16 sublane packing)
    tr = min(tr, 4096)                         # keep double-buffered slabs << 32 MiB (v7x VMEM)
    rows_pad = _round_up(rows, tr)
    b_pad = rows_pad * P

    # ---- lane-packed views (free: contiguous row-major reshapes) ------------
    if b_pad != B:
        x = jnp.pad(x, ((0, b_pad - B), (0, 0)))
    xp = x.reshape(rows_pad, P * obs_dim).astype(compute_dtype)

    # Block-diagonal packed weights: P copies of w1 / w2 on the diagonal.
    w1p = jnp.kron(jnp.eye(P, dtype=jnp.float32), w1.astype(jnp.float32)).astype(compute_dtype)
    w2p = jnp.kron(jnp.eye(P, dtype=jnp.float32), w2.astype(jnp.float32)).astype(compute_dtype)
    b1p = jnp.tile(b1, (1, P))                 # (1, P*hidden) f32
    b2p = jnp.tile(b2, (1, P))                 # (1, P*act)    f32

    grid = (rows_pad // tr,)
    out_packed = pl.pallas_call(
        mask_mlp_kernel,
        out_shape=jax.ShapeDtypeStruct((rows_pad, P * act_dim), jnp.float32),
        grid_spec=pltpu.PrefetchScalarGridSpec(
            num_scalar_prefetch=0,
            grid=grid,
            in_specs=[
                pl.BlockSpec((tr, P * obs_dim), lambda i: (i, 0)),          # x slab (pipelined)
                pl.BlockSpec((P * obs_dim, P * hidden), lambda i: (0, 0)),  # w1 packed (resident)
                pl.BlockSpec((1, P * hidden), lambda i: (0, 0)),            # b1 packed
                pl.BlockSpec((P * hidden, P * act_dim), lambda i: (0, 0)),  # w2 packed (resident)
                pl.BlockSpec((1, P * act_dim), lambda i: (0, 0)),           # b2 packed
            ],
            out_specs=pl.BlockSpec((tr, P * act_dim), lambda i: (i, 0)),    # 128-lane dense store
        ),
        compiler_params=pltpu.CompilerParams(
            dimension_semantics=("parallel",),        # batch axis shards across v7x's 2 TCs
            vmem_limit_bytes=32 * 1024 * 1024,        # explicit budget, safe on v5e/v6e/v7x
        ),
    )(xp, w1p, b1p, w2p, b2p)

    # Unpack the lane slabs back to (B, act_dim): contiguous reshape + row slice.
    return out_packed.reshape(b_pad, act_dim)[:B]


if __name__ == "__main__":
    # Small shapes consistent with the module: obs_dim=32, act_dim=16, hidden=64.
    # batch deliberately NOT a multiple of the pack/tile to exercise padding,
    # and batch_tile=128 so the grid has >1 pipelined step.
    obs_dim, act_dim, hidden, batch = 32, 16, 64, 204

    key = jax.random.PRNGKey(0)
    k_x, k_w1, k_b1, k_w2, k_b2 = jax.random.split(key, 5)

    bound1 = 1.0 / (obs_dim ** 0.5)
    bound2 = 1.0 / (hidden ** 0.5)
    w1 = jax.random.uniform(k_w1, (obs_dim, hidden), jnp.float32, -bound1, bound1)
    b1 = jax.random.uniform(k_b1, (1, hidden), jnp.float32, -bound1, bound1)
    w2 = jax.random.uniform(k_w2, (hidden, act_dim), jnp.float32, -bound2, bound2)
    b2 = jax.random.uniform(k_b2, (1, act_dim), jnp.float32, -bound2, bound2)
    x = jax.random.normal(k_x, (batch, obs_dim), jnp.float32)

    logprobs = mask_model_forward(x, w1, b1, w2, b2, batch_tile=128)
    logprobs = jax.block_until_ready(logprobs)
    assert logprobs.shape == (batch, act_dim)

    # Reference 1: same bf16 input/weight quantization as the kernel (tight check).
    f32 = jnp.float32
    xq = x.astype(jnp.bfloat16).astype(f32)
    w1q = w1.astype(jnp.bfloat16).astype(f32)
    w2q = w2.astype(jnp.bfloat16).astype(f32)
    h_q = jnp.maximum(xq @ w1q + b1, 0.0).astype(jnp.bfloat16).astype(f32)
    ref_q = jnp.log(jax.nn.sigmoid(h_q @ w2q + b2) + 1e-9)
    assert jnp.allclose(logprobs, ref_q, atol=1e-4, rtol=1e-4)

    # Reference 2: pure-f32 forward (loose semantic sanity check).
    h32 = jnp.maximum(x @ w1 + b1, 0.0)
    ref32 = jnp.log(jax.nn.sigmoid(h32 @ w2 + b2) + 1e-9)
    assert jnp.allclose(logprobs, ref32, atol=5e-2, rtol=5e-2)

    print("KERNEL_OK")
</pallas_src>

<mosaic_0001>
module attributes {stable_mosaic.version = 11 : i64} {
  func.func @mask_mlp_kernel(%arg0: i32, %arg1: memref<16x256xbf16, #tpu.memory_space<vmem>>, %arg2: memref<256x512xbf16, #tpu.memory_space<vmem>>, %arg3: memref<1x512xf32, #tpu.memory_space<vmem>>, %arg4: memref<512x128xbf16, #tpu.memory_space<vmem>>, %arg5: memref<1x128xf32, #tpu.memory_space<vmem>>, %arg6: memref<16x128xf32, #tpu.memory_space<vmem>>) attributes {dimension_semantics = [#tpu.dimension_semantics<parallel>], iteration_bounds = array<i64: 2>, scalar_prefetch = 0 : i64, scratch_operands = 0 : i64, tpu.core_type = #tpu.core_type<tc>, window_params = [{transform_indices = @transform_0, window_bounds = array<i64: 16, 256>}, {pipeline_mode = #tpu.pipeline_mode<synchronous>, transform_indices = @transform_1, window_bounds = array<i64: 256, 512>}, {pipeline_mode = #tpu.pipeline_mode<synchronous>, transform_indices = @transform_2, window_bounds = array<i64: 1, 512>}, {pipeline_mode = #tpu.pipeline_mode<synchronous>, transform_indices = @transform_3, window_bounds = array<i64: 512, 128>}, {pipeline_mode = #tpu.pipeline_mode<synchronous>, transform_indices = @transform_4, window_bounds = array<i64: 1, 128>}, {transform_indices = @transform_5, window_bounds = array<i64: 16, 128>}]} {
    %c0 = arith.constant 0 : index
    %c0_0 = arith.constant 0 : index
    %0 = vector.load %arg1[%c0, %c0_0] : memref<16x256xbf16, #tpu.memory_space<vmem>>, vector<16x256xbf16>
    %c0_1 = arith.constant 0 : index
    %c0_2 = arith.constant 0 : index
    %1 = vector.load %arg2[%c0_1, %c0_2] : memref<256x512xbf16, #tpu.memory_space<vmem>>, vector<256x512xbf16>
    %cst = arith.constant dense<0.000000e+00> : vector<16x512xf32>
    %2 = tpu.matmul %0, %1, %cst {dimension_numbers = #tpu.dot_dimension_numbers<[1], [0], [0], [1], [0, 0, 1, 1], [], []>} : vector<16x256xbf16>, vector<256x512xbf16>, vector<16x512xf32> -> vector<16x512xf32>
    %c0_3 = arith.constant 0 : index
    %c0_4 = arith.constant 0 : index
    %3 = vector.load %arg3[%c0_3, %c0_4] : memref<1x512xf32, #tpu.memory_space<vmem>>, vector<1x512xf32>
    %4 = vector.broadcast %3 : vector<1x512xf32> to vector<16x512xf32>
    %5 = arith.addf %2, %4 : vector<16x512xf32>
    %cst_5 = arith.constant 0.000000e+00 : f32
    %6 = vector.broadcast %cst_5 : f32 to vector<16x512xf32>
    %7 = arith.maximumf %5, %6 : vector<16x512xf32>
    %8 = arith.truncf %7 : vector<16x512xf32> to vector<16x512xbf16>
    %c0_6 = arith.constant 0 : index
    %c0_7 = arith.constant 0 : index
    %9 = vector.load %arg4[%c0_6, %c0_7] : memref<512x128xbf16, #tpu.memory_space<vmem>>, vector<512x128xbf16>
    %cst_8 = arith.constant dense<0.000000e+00> : vector<16x128xf32>
    %10 = tpu.matmul %8, %9, %cst_8 {dimension_numbers = #tpu.dot_dimension_numbers<[1], [0], [0], [1], [0, 0, 1, 1], [], []>} : vector<16x512xbf16>, vector<512x128xbf16>, vector<16x128xf32> -> vector<16x128xf32>
    %c0_9 = arith.constant 0 : index
    %c0_10 = arith.constant 0 : index
    %11 = vector.load %arg5[%c0_9, %c0_10] : memref<1x128xf32, #tpu.memory_space<vmem>>, vector<1x128xf32>
    %12 = vector.broadcast %11 : vector<1x128xf32> to vector<16x128xf32>
    %13 = arith.addf %10, %12 : vector<16x128xf32>
    %14 = arith.negf %13 : vector<16x128xf32>
    %15 = math.exp %14 : vector<16x128xf32>
    %cst_11 = arith.constant 1.000000e+00 : f32
    %16 = vector.broadcast %cst_11 : f32 to vector<16x128xf32>
    %17 = arith.addf %16, %15 : vector<16x128xf32>
    %18 = arith.divf %16, %17 : vector<16x128xf32>
    %cst_12 = arith.constant 9.99999971E-10 : f32
    %19 = vector.broadcast %cst_12 : f32 to vector<16x128xf32>
    %20 = arith.addf %18, %19 : vector<16x128xf32>
    %21 = math.log %20 : vector<16x128xf32>
    %c0_13 = arith.constant 0 : index
    %c0_14 = arith.constant 0 : index
    %22 = vector.load %arg6[%c0_13, %c0_14] : memref<16x128xf32, #tpu.memory_space<vmem>>, vector<16x128xf32>
    tpu.vector_store %arg6[%c0_13, %c0_14], %21 {strides = array<i32>} : memref<16x128xf32, #tpu.memory_space<vmem>>, vector<16x128xf32>,
    return
  }
  func.func @transform_0(%arg0: i32) -> (i32, i32) {
    %c0_i32 = arith.constant 0 : i32
    %c0_i32_0 = arith.constant 0 : i32
    return %arg0, %c0_i32 : i32, i32
  }
  func.func @transform_1(%arg0: i32) -> (i32, i32) {
    %c0_i32 = arith.constant 0 : i32
    %c0_i32_0 = arith.constant 0 : i32
    %c0_i32_1 = arith.constant 0 : i32
    return %c0_i32, %c0_i32_0 : i32, i32
  }
  func.func @transform_2(%arg0: i32) -> (i32, i32) {
    %c0_i32 = arith.constant 0 : i32
    %c0_i32_0 = arith.constant 0 : i32
    %c0_i32_1 = arith.constant 0 : i32
    return %c0_i32, %c0_i32_0 : i32, i32
  }
  func.func @transform_3(%arg0: i32) -> (i32, i32) {
    %c0_i32 = arith.constant 0 : i32
    %c0_i32_0 = arith.constant 0 : i32
    %c0_i32_1 = arith.constant 0 : i32
    return %c0_i32, %c0_i32_0 : i32, i32
  }
  func.func @transform_4(%arg0: i32) -> (i32, i32) {
    %c0_i32 = arith.constant 0 : i32
    %c0_i32_0 = arith.constant 0 : i32
    %c0_i32_1 = arith.constant 0 : i32
    return %c0_i32, %c0_i32_0 : i32, i32
  }
  func.func @transform_5(%arg0: i32) -> (i32, i32) {
    %c0_i32 = arith.constant 0 : i32
    %c0_i32_0 = arith.constant 0 : i32
    return %arg0, %c0_i32 : i32, i32
  }
}

</mosaic_0001>

<bundles_post_ra>
// kernel: tpu_custom_call.1
= control target key start
LH: loop header
LB: loop body
LE: loop exit
PB: predicated region body
PF: predicated region fallthrough
CT: control target
= control target key end

     0   :  { %10 = vsyncpa [#allocation3], 0  ;;  %s2096_s0 = inlined_call_operand.hbm [shape: bf16[32,256], index: 0, kind: input, shape index: {}]   ;;  %s2097_s1 = inlined_call_operand.hbm [shape: bf16[256,512], index: 1, kind: input, shape index: {}]   ;;  %s2098_s2 = inlined_call_operand.vmem [shape: f32[1,512], index: 2, kind: input, shape index: {}]   ;;  %s2099_s3 = inlined_call_operand.hbm [shape: bf16[512,128], index: 3, kind: input, shape index: {}]   ;;  %s2100_s4 = inlined_call_operand.vmem [shape: f32[1,128], index: 4, kind: input, shape index: {}]   ;;  %s2101_s5 = inlined_call_operand.hbm [shape: f32[32,128], index: 5, kind: output, shape index: {}]  }
   0x1   :  { %12 = vsyncpa [#allocation3 + $0x1], 0 }
   0x2   :  { %13 = vsyncpa [#allocation6], 0 }
   0x3   :  { %14 = vsyncpa [#allocation4], 0 }
   0x4   :  { %16 = vsyncpa [#allocation4 + $0x1], 0  ;;  %s1848_s18 = smov 0   ;;  %s1850_s19 = smov 0  }
   0x5   :  { %s1852_s20 = smov 0   ;;  %s1854_s21 = smov 0  }
   0x6 LB: > { %s1869_s22 = sadd.s32 4294967295, %s1804_s21   ;;  %s1263_s23 = sadd.s32 4294967294, %s1804_s21   ;;  %s1804_s21 = sphi %s1854_s21, %s2121_s21   ;;  %s1800_s20 = sphi %s1852_s20, %s2120_s20   ;;  %s1796_s19 = sphi %s1850_s19, %s2119_s19   ;;  %s1792_s18 = sphi %s1848_s18, %s2118_s18  }
   0x7   : > { %p42_p0 = scmp.ne.s32.totalorder %s1796_s19, %s1792_s18  ;;  %p2102_p1 = scmp.eq.s32.totalorder %s1869_s22, 0 }
   0x8   : > { %p156_p3 = scmp.eq.s32.totalorder %s1263_s23, 1  ;;  %p1264_p5 = scmp.ge.s32.totalorder %s1804_s21, 1 }
   0x9   : > { %p1878_p4 = por %p2102_p1, %p42_p0  ;;  %p163_p7 = scmp.lt.s32.totalorder %s1804_s21, 3 }
   0xa   : > { %p1883_p6 = por %p156_p3, %p42_p0  ;;  %s1806_s27 = smov [#allocation5]  }
   0xb   : > { %s2105_s24 = scalar_select %p1878_p4, 1, 0 }
   0xc   : > { %s2106_s25 = scalar_select %p1883_p6, 1, 0 }
   0xd   : > { %p1888_p8 = pnand %p1264_p5, %p163_p7  ;;  %s175_s28 = sshll.u32 %s1806_s27, 4  ;;  %s1892_s28 = int_to_ptr.vmem [resolvable:$true] %s175_s28 }
   0xe   : > { %s1807_s30 = smov [#allocation7]   ;;  %s1648_s9 = scalar_lea.hbm %s2097_s1, 8192 }
   0xf   : > { %p1442_p9 = pneg %p1888_p8  ;;  %s191_s6 = sshll.u32 %s1807_s30, 4  ;;  %s1903_s6 = int_to_ptr.vmem [resolvable:$true] %s191_s6 }
  0x10   : > { %p1649_p12 = scmp.ne.s32.totalorder %s2097_s1, %s1648_s9  ;;  %p1655_p5 = scmp.lt.u32.totalorder %s1648_s9, %s2097_s1 }
  0x11   : > { %p1899_p11 = pnand %p1442_p9, %p2102_p1 }
  0x13   : > { %p1650_p13 = pneg %p1899_p11 }
  0x15   : > { %p1651_p0 = pnand %p1650_p13, %p1649_p12 }
  0x17   : > { %p1652_p3 = pneg %p1651_p0 }
  0x19   : > { %p1657_p7 = pnand %p1655_p5, %p1652_p3 }
  0x1b   : > { %1660 = shalt.err (!%p1657_p7)
}
  0x1c   : > { %s1661_s14 = scalar_lea.vmem %s1892_s28, 8192  ;;  %p1669_p2 = scmp.lt.s32.totalorder %s1892_s28, %s1892_s28 }
  0x1d   : > { %p1662_p9 = scmp.ne.s32.totalorder %s1892_s28, %s1661_s14  ;;  %p1670_p12 = scmp.lt.s32.totalorder %s1661_s14, %s1661_s14 }
  0x1f   : > { %p1664_p10 = pnand %p1662_p9, %p1650_p13  ;;  %p1671_p0 = por %p1670_p12, %p1669_p2 }
  0x21   : > { %p1665_p1 = pneg %p1664_p10 }
  0x23   : > { %p1672_p6 = pnand %p1671_p0, %p1665_p1 }
  0x25   : > { %1675 = shalt.err (!%p1672_p6)
}
  0x26   : > { %s1808_s15 = smov 256   ;;  %s1809_s16 = smov 16  }
  0x27   : > { %1445 = dma.hbm_to_vmem [thread:$0]  (!%p1899_p11), %s2097_s1, 8192, %s1892_s28, [#allocation6], %s1808_s15, %s1808_s15, %s1809_s16  }
  0x28   : > { %s1676_s7 = scalar_lea.hbm %s2099_s3, 4096 }
  0x29   : > { %p1677_p2 = scmp.ne.s32.totalorder %s2099_s3, %s1676_s7  ;;  %p1683_p10 = scmp.lt.u32.totalorder %s1676_s7, %s2099_s3 }
  0x2b   : > { %p1679_p1 = pnand %p1677_p2, %p1650_p13 }
  0x2d   : > { %p1680_p6 = pneg %p1679_p1 }
  0x2f   : > { %p1685_p3 = pnand %p1683_p10, %p1680_p6 }
  0x31   : > { %1688 = shalt.err (!%p1685_p3)
}
  0x32   : > { %s1689_s28 = scalar_lea.vmem %s1903_s6, 4096  ;;  %p1697_p12 = scmp.lt.s32.totalorder %s1903_s6, %s1903_s6 }
  0x33   : > { %p1690_p5 = scmp.ne.s32.totalorder %s1903_s6, %s1689_s28  ;;  %p1698_p0 = scmp.lt.s32.totalorder %s1689_s28, %s1689_s28 }
  0x35   : > { %p1692_p7 = pnand %p1690_p5, %p1650_p13  ;;  %p1699_p2 = por %p1698_p0, %p1697_p12 }
  0x37   : > { %p1693_p9 = pneg %p1692_p7 }
  0x39   : > { %p1700_p1 = pnand %p1699_p2, %p1693_p9 }
  0x3b   : > { %1703 = shalt.err (!%p1700_p1)
}
  0x3c   : > { %s1810_s12 = smov 64   ;;  %s1811_s13 = smov 4  }
  0x3d   : > { %1448 = dma.hbm_to_vmem [thread:$0]  (!%p1899_p11), %s2099_s3, 4096, %s1903_s6, [#allocation6], %s1810_s12, %s1810_s12, %s1811_s13  }
  0x3e   : > { %s1958_s16 = sadd.s32 1, %s1804_s21   ;;  %s29_s23 = sadd.s32 1, %s1800_s20 }
  0x3f   : > { %s26_s17 = ssub.s32 %s1804_s21, %s1958_s16  ;;  %p36_p6 = scmp.ne.s32.totalorder %s1800_s20, %s1796_s19 }
  0x40   : > { %p27_p13 = scmp.eq.s32.totalorder %s26_s17, 0  ;;  %p37_p10 = scmp.eq.s32.totalorder %s1804_s21, 0 }
  0x41   : > { %p2109_p5 = scmp.eq.s32.totalorder %s1869_s22, 1  ;;  %p1459_p9 = scmp.lt.s32.totalorder %s1804_s21, 2 }
  0x42   : > { %s1967_s27 = scalar_select %p27_p13, %s1800_s20, %s29_s23  }
  0x43   : > { %p38_p3 = por %p37_p10, %p36_p6  ;;  %p1971_p7 = por %p2109_p5, %p36_p6 }
  0x44   : > { %s208_s29 = sand.u32 1, %s1800_s20   ;;  %s1384_s6 = sshll.u32 %s1804_s21, 8 }
  0x45   : > { %s2110_s30 = scalar_select %p1971_p7, 1, 0 }
  0x46   : > { %s1268_s7 = sshll.u32 %s208_s29, 4  ;;  %s1981_s10 = scalar_lea.hbm %s2096_s0, %s1384_s6 }
  0x47   : > { %s212_s11 = scalar_lea.vmem [#allocation2], %s1268_s7  ;;  %p1985_p11 = pnand %p1459_p9, %p38_p3 }
  0x48   : > { %s220_s28 = sshll.u32 %s212_s11, 4  ;;  %s1989_s13 = scalar_lea.sflag [#allocation3], %s208_s29  ;;  %s1983_s28 = int_to_ptr.vmem [resolvable:$true] %s220_s28 }
  0x49   : > { %s1704_s14 = scalar_lea.hbm %s1981_s10, 256  ;;  %p1706_p0 = pneg %p1985_p11 }
  0x4a   : > { %p1705_p12 = scmp.ne.s32.totalorder %s1981_s10, %s1704_s14  ;;  %s1709_s23 = scalar_lea.hbm %s2096_s0, 512 }
  0x4b   : > { %p1710_p13 = scmp.lt.u32.totalorder %s1981_s10, %s2096_s0  ;;  %p1711_p6 = scmp.lt.u32.totalorder %s1709_s23, %s1704_s14 }
  0x4c   : > { %p1707_p2 = pnand %p1706_p0, %p1705_p12  ;;  %p1713_p3 = scmp.lt.u32.totalorder %s1704_s14, %s1981_s10 }
  0x4d   : > { %p1712_p10 = por %p1711_p6, %p1710_p13 }
  0x4e   : > { %p1708_p1 = pneg %p1707_p2 }
  0x4f   : > { %p1714_p5 = por %p1713_p3, %p1712_p10 }
  0x51   : > { %p1715_p9 = pnand %p1714_p5, %p1708_p1 }
  0x53   : > { %1718 = shalt.err (!%p1715_p9)
}
  0x54   : > { %s1719_s29 = scalar_lea.vmem %s1983_s28, 256  ;;  %s1812_s8 = smov [#allocation2]  }
  0x55   : > { %p1720_p12 = scmp.ne.s32.totalorder %s1983_s28, %s1719_s29  ;;  %s1724_s9 = sshll.u32 %s1812_s8, 4  ;;  %s1725_s9 = int_to_ptr.vmem [resolvable:$false] %s1724_s9 }
  0x56   : > { %s1726_s11 = scalar_lea.vmem %s1725_s9, 512  ;;  %p1727_p4 = scmp.lt.s32.totalorder %s1983_s28, %s1725_s9 }
  0x57   : > { %p1722_p2 = pnand %p1720_p12, %p1706_p0  ;;  %p1728_p13 = scmp.lt.s32.totalorder %s1726_s11, %s1719_s29 }
  0x59   : > { %p1723_p7 = pneg %p1722_p2  ;;  %p1729_p6 = por %p1728_p13, %p1727_p4 }
  0x5b   : > { %p1730_p10 = pnand %p1729_p6, %p1723_p7 }
  0x5d   : > { %1733 = shalt.err (!%p1730_p10)
}
  0x5e   : > { %s1813_s14 = smov 128   ;;  %s1814_s15 = smov 8  }
  0x5f   : > { %1452 = dma.hbm_to_vmem [thread:$0]  (!%p1985_p11), %s1981_s10, 256, %s1983_s28, %s1989_s13, %s1813_s14, %s1813_s14, %s1814_s15  }
  0x60   : > { %232 = sbr.rel (%p1888_p8) target bundleno = 671 (0x29f), region = 40  ;;  %s2020_s17 = sand.u32 (!%p1888_p8), 1, %s1796_s19  }
  0x61   : > { %s1273_s23 = sshll.u32 (!%p1888_p8), %s2020_s17, 4  ;;  %s235_s7 = scalar_lea.sflag (!%p1888_p8), [#allocation3], %s2020_s17 }
  0x62   : > { %s2026_s6 = scalar_lea.vmem (!%p1888_p8), [#allocation2], %s1273_s23  ;;  %p2112_p4 = scmp.ne.s32.totalorder (!%p1888_p8), %s2105_s24, 0 }
  0x67   : > { %1779 = dma.done.wait (%p2112_p4), %s235_s7, 256  }
  0x68   : > { %1781 = vsyncadd (%p2112_p4), %s235_s7, 4294967040  ;;  %p2113_p7 = scmp.eq.s32.totalorder %s1869_s22, 0 }
  0x6a   : > { %1783 = dma.done.wait (%p2113_p7), [#allocation6], 12288   ;;  %p2114_p8 = pmov %p2113_p7 }
  0x6b   : > { %v1505_v0 = vld [vmem:[#allocation5 + $0x4] ss:$16 sps:$4 sm:$0xff]   ;;  %v1507_v1 = vld [vmem:[#allocation5 + $0xc] ss:$16 sps:$4 sm:$0xff]   ;;  %v1509_v2 = vld [vmem:[#allocation5] ss:$16 sps:$4 sm:$0xff]  }
  0x6c   : > { %1785 = vsyncadd (%p2114_p8), [#allocation6], 4294955008  ;;  %694 = vmatprep.subr.bf16.mxu0 %v1505_v0  ;;  %v1510_v3 = vld [vmem:[#allocation5 + $0x8] ss:$16 sps:$4 sm:$0xff]   ;;  %737 = vmatprep.subr.bf16.mxu1 %v1507_v1  ;;  %v1511_v4 = vld [vmem:[#allocation5 + $0x24] ss:$16 sps:$4 sm:$0xff]  }
  0x6d   : > { %695 = vmatpush1.bf16.msra.mxu0 %v1509_v2  ;;  %738 = vmatpush1.bf16.msra.mxu1 %v1510_v3  ;;  %v1513_v5 = vld [vmem:[#allocation5 + $0x2c] ss:$16 sps:$4 sm:$0xff]   ;;  %v1515_v6 = vld [vmem:[#allocation5 + $0x20] ss:$16 sps:$4 sm:$0xff]   ;;  %v1516_v7 = vld [vmem:[#allocation5 + $0x28] ss:$16 sps:$4 sm:$0xff]  }
  0x6e   : > { %696 = vmatprep.subr.bf16.mxu0 %v1511_v4  ;;  %739 = vmatprep.subr.bf16.mxu1 %v1513_v5  ;;  %v1517_v8 = vld [vmem:[#allocation5 + $0x44] ss:$16 sps:$4 sm:$0xff]   ;;  %v1519_v9 = vld [vmem:[#allocation5 + $0x4c] ss:$16 sps:$4 sm:$0xff]   ;;  %v1521_v10 = vld [vmem:[#allocation5 + $0x40] ss:$16 sps:$4 sm:$0xff]  }
  0x6f   : > { %v1522_v11 = vld [vmem:[#allocation5 + $0x48] ss:$16 sps:$4 sm:$0xff]   ;;  %v1523_v12 = vld [vmem:[#allocation5 + $0x64] ss:$16 sps:$4 sm:$0xff]   ;;  %v1525_v13 = vld [vmem:[#allocation5 + $0x6c] ss:$16 sps:$4 sm:$0xff]  }
  0x70   : > { %v1527_v14 = vld [vmem:[#allocation5 + $0x60] ss:$16 sps:$4 sm:$0xff]   ;;  %v1528_v15 = vld [vmem:[#allocation5 + $0x68] ss:$16 sps:$4 sm:$0xff]   ;;  %v1529_v16 = vld [vmem:[#allocation5 + $0x84] ss:$16 sps:$4 sm:$0xff]  }
  0x71   : > { %697 = vmatpush1.bf16.msra.mxu0 %v1515_v6  ;;  %740 = vmatpush1.bf16.msra.mxu1 %v1516_v7  ;;  %v1531_v17 = vld [vmem:[#allocation5 + $0x8c] ss:$16 sps:$4 sm:$0xff]   ;;  %v1533_v18 = vld [vmem:[#allocation5 + $0x80] ss:$16 sps:$4 sm:$0xff]   ;;  %v1534_v19 = vld [vmem:[#allocation5 + $0x88] ss:$16 sps:$4 sm:$0xff]  }
  0x72   : > { %698 = vmatprep.subr.bf16.mxu0 %v1517_v8  ;;  %741 = vmatprep.subr.bf16.mxu1 %v1519_v9  ;;  %v1535_v20 = vld [vmem:[#allocation5 + $0xa4] ss:$16 sps:$4 sm:$0xff]   ;;  %v1537_v21 = vld [vmem:[#allocation5 + $0xac] ss:$16 sps:$4 sm:$0xff]   ;;  %v1539_v22 = vld [vmem:[#allocation5 + $0xa0] ss:$16 sps:$4 sm:$0xff]  }
  0x73   : > { %v1540_v23 = vld [vmem:[#allocation5 + $0xa8] ss:$16 sps:$4 sm:$0xff]   ;;  %v1541_v24 = vld [vmem:[#allocation5 + $0xc4] ss:$16 sps:$4 sm:$0xff]   ;;  %v1543_v25 = vld [vmem:[#allocation5 + $0xcc] ss:$16 sps:$4 sm:$0xff]  }
  0x74   : > { %v1545_v26 = vld [vmem:[#allocation5 + $0xc0] ss:$16 sps:$4 sm:$0xff]   ;;  %v1546_v27 = vld [vmem:[#allocation5 + $0xc8] ss:$16 sps:$4 sm:$0xff]   ;;  %v1547_v28 = vld [vmem:[#allocation5 + $0xe4] ss:$16 sps:$4 sm:$0xff]  }
  0x75   : > { %699 = vmatpush1.bf16.msra.mxu0 %v1521_v10  ;;  %742 = vmatpush1.bf16.msra.mxu1 %v1522_v11  ;;  %v1549_v29 = vld [vmem:[#allocation5 + $0xec] ss:$16 sps:$4 sm:$0xff]   ;;  %v1551_v30 = vld [vmem:[#allocation5 + $0xe0] ss:$16 sps:$4 sm:$0xff]   ;;  %v1552_v31 = vld [vmem:[#allocation5 + $0xe8] ss:$16 sps:$4 sm:$0xff]  }
  0x76   : > { %700 = vmatprep.subr.bf16.mxu0 %v1523_v12  ;;  %743 = vmatprep.subr.bf16.mxu1 %v1525_v13  ;;  %v1553_v32 = vld [vmem:[#allocation5 + $0x104] ss:$16 sps:$4 sm:$0xff]   ;;  %v1555_v33 = vld [vmem:[#allocation5 + $0x10c] ss:$16 sps:$4 sm:$0xff]   ;;  %v1557_v34 = vld [vmem:[#allocation5 + $0x100] ss:$16 sps:$4 sm:$0xff]  }
  0x77   : > { %v1558_v35 = vld [vmem:[#allocation5 + $0x108] ss:$16 sps:$4 sm:$0xff]   ;;  %v1559_v36 = vld [vmem:[#allocation5 + $0x124] ss:$16 sps:$4 sm:$0xff]   ;;  %v1561_v37 = vld [vmem:[#allocation5 + $0x12c] ss:$16 sps:$4 sm:$0xff]  }
  0x78   : > { %v1563_v38 = vld [vmem:[#allocation5 + $0x120] ss:$16 sps:$4 sm:$0xff]   ;;  %v1564_v39 = vld [vmem:[#allocation5 + $0x128] ss:$16 sps:$4 sm:$0xff]   ;;  %v1565_v40 = vld [vmem:[#allocation5 + $0x144] ss:$16 sps:$4 sm:$0xff]  }
  0x79   : > { %701 = vmatpush1.bf16.msra.mxu0 %v1527_v14  ;;  %744 = vmatpush1.bf16.msra.mxu1 %v1528_v15  ;;  %v1567_v41 = vld [vmem:[#allocation5 + $0x14c] ss:$16 sps:$4 sm:$0xff]   ;;  %v1569_v42 = vld [vmem:[#allocation5 + $0x140] ss:$16 sps:$4 sm:$0xff]   ;;  %v1570_v43 = vld [vmem:[#allocation5 + $0x148] ss:$16 sps:$4 sm:$0xff]  }
  0x7a   : > { %702 = vmatprep.subr.bf16.mxu0 %v1529_v16  ;;  %745 = vmatprep.subr.bf16.mxu1 %v1531_v17  ;;  %v1571_v44 = vld [vmem:[#allocation5 + $0x164] ss:$16 sps:$4 sm:$0xff]   ;;  %v1573_v45 = vld [vmem:[#allocation5 + $0x16c] ss:$16 sps:$4 sm:$0xff]   ;;  %v1575_v46 = vld [vmem:[#allocation5 + $0x160] ss:$16 sps:$4 sm:$0xff]  }
  0x7b   : > { %v1576_v47 = vld [vmem:[#allocation5 + $0x168] ss:$16 sps:$4 sm:$0xff]   ;;  %v1603_v48 = vld [vmem:[%s2026_s6 + $0x4] ss:$8 sps:$4 sm:$0xff]   ;;  %v1581_v51 = vld [vmem:[#allocation5 + $0x180] ss:$16 sps:$4 sm:$0xff]  }
  0x7c   : > { %v1577_v49 = vld [vmem:[#allocation5 + $0x184] ss:$16 sps:$4 sm:$0xff]   ;;  %v1579_v50 = vld [vmem:[#allocation5 + $0x18c] ss:$16 sps:$4 sm:$0xff]   ;;  %726 = vmatprep.mubr.bf16.mxu0 %v1603_v48  ;;  %769 = vmatprep.mubr.bf16.mxu1 %v1603_v48  ;;  %v1582_v52 = vld [vmem:[#allocation5 + $0x188] ss:$16 sps:$4 sm:$0xff]  }
  0x7d   : > { %703 = vmatpush1.bf16.msra.mxu0 %v1533_v18  ;;  %746 = vmatpush1.bf16.msra.mxu1 %v1534_v19  ;;  %v1583_v53 = vld [vmem:[#allocation5 + $0x1a4] ss:$16 sps:$4 sm:$0xff]   ;;  %v1585_v54 = vld [vmem:[#allocation5 + $0x1ac] ss:$16 sps:$4 sm:$0xff]   ;;  %v1587_v55 = vld [vmem:[#allocation5 + $0x1a0] ss:$16 sps:$4 sm:$0xff]  }
  0x7e   : > { %704 = vmatprep.subr.bf16.mxu0 %v1535_v20  ;;  %747 = vmatprep.subr.bf16.mxu1 %v1537_v21  ;;  %v1588_v56 = vld [vmem:[#allocation5 + $0x1a8] ss:$16 sps:$4 sm:$0xff]   ;;  %v1589_v57 = vld [vmem:[#allocation5 + $0x1c4] ss:$16 sps:$4 sm:$0xff]   ;;  %v1591_v58 = vld [vmem:[#allocation5 + $0x1cc] ss:$16 sps:$4 sm:$0xff]  }
  0x7f   : > { %v1593_v59 = vld [vmem:[#allocation5 + $0x1c0] ss:$16 sps:$4 sm:$0xff]   ;;  %v1594_v60 = vld [vmem:[#allocation5 + $0x1c8] ss:$16 sps:$4 sm:$0xff]   ;;  %v1595_v61 = vld [vmem:[#allocation5 + $0x1e4] ss:$16 sps:$4 sm:$0xff]  }
  0x80   : > { %v1597_v62 = vld [vmem:[#allocation5 + $0x1ec] ss:$16 sps:$4 sm:$0xff]   ;;  %v1599_v63 = vld [vmem:[#allocation5 + $0x1e0] ss:$16 sps:$4 sm:$0xff]   ;;  %v1600_v0 = vld [vmem:[#allocation5 + $0x1e8] ss:$16 sps:$4 sm:$0xff]  }
  0x81   : > { %705 = vmatpush1.bf16.msra.mxu0 %v1539_v22  ;;  %748 = vmatpush1.bf16.msra.mxu1 %v1540_v23  ;;  %v1604_v1 = vld [vmem:[#allocation7 + $0x40] sm:$0xff]   ;;  %v1608_v6 = vld [vmem:[#allocation7 + $0x48] sm:$0xff]   ;;  %v1612_v10 = vld [vmem:[#allocation7 + $0x50] sm:$0xff]   ;;  %s1385_s12 = sshll.u32 %s1869_s22, 8  ;;  %s272_s13 = scalar_lea.vmem [#allocation8], %s1273_s23 }
  0x82   : > { %706 = vmatprep.subr.bf16.mxu0 %v1541_v24  ;;  %749 = vmatprep.subr.bf16.mxu1 %v1543_v25  ;;  %v1601_v2 = vld [vmem:[%s2026_s6] ss:$8 sps:$4 sm:$0xff]   ;;  %s1171_s29 = sshll.u32 %s272_s13, 4  ;;  %s2050_s11 = scalar_lea.hbm %s2101_s5, %s1385_s12  ;;  %s2052_s29 = int_to_ptr.vmem [resolvable:$true] %s1171_s29 }
  0x83   : > { %v1605_v3 = vld [vmem:[#allocation7 + $0xc0] sm:$0xff]   ;;  %v1609_v7 = vld [vmem:[#allocation7 + $0xc8] sm:$0xff]   ;;  %v1613_v11 = vld [vmem:[#allocation7 + $0xd0] sm:$0xff]   ;;  %s1158_s22 = scalar_lea.sflag [#allocation4], %s2020_s17  ;;  %s1734_s14 = scalar_lea.vmem %s2052_s29, 256 }
  0x84   : > { %v1606_v4 = vld [vmem:[#allocation7] sm:$0xff]   ;;  %v1610_v8 = vld [vmem:[#allocation7 + $0x8] sm:$0xff]   ;;  %v1614_v12 = vld [vmem:[#allocation7 + $0x10] sm:$0xff]   ;;  %p1735_p11 = scmp.ne.s32.totalorder %s2052_s29, %s1734_s14  ;;  %p2115_p0 = scmp.ne.s32.totalorder %s2110_s30, 0 }
  0x85   : > { %707 = vmatpush1.bf16.msra.mxu0 %v1545_v26  ;;  %750 = vmatpush1.bf16.msra.mxu1 %v1546_v27  ;;  %v1607_v5 = vld [vmem:[#allocation7 + $0x80] sm:$0xff]   ;;  %v1611_v9 = vld [vmem:[#allocation7 + $0x88] sm:$0xff]   ;;  %v1615_v13 = vld [vmem:[#allocation7 + $0x90] sm:$0xff]   ;;  %s1815_s15 = smov [#allocation8]  }
  0x86   : > { %708 = vmatprep.subr.bf16.mxu0 %v1547_v28  ;;  %751 = vmatprep.subr.bf16.mxu1 %v1549_v29  ;;  %v1616_v14 = vld [vmem:[#allocation7 + $0x58] sm:$0xff]   ;;  %v1620_v18 = vld [vmem:[#allocation7 + $0x60] sm:$0xff]   ;;  %v1624_v22 = vld [vmem:[#allocation7 + $0x68] sm:$0xff]   ;;  %p1736_p1 = pnand %p1735_p11, %p2115_p0  ;;  %s1738_s23 = sshll.u32 %s1815_s15, 4  ;;  %s1739_s23 = int_to_ptr.vmem [resolvable:$false] %s1738_s23 }
  0x87   : > { %v1617_v15 = vld [vmem:[#allocation7 + $0xd8] sm:$0xff]   ;;  %v1621_v19 = vld [vmem:[#allocation7 + $0xe0] sm:$0xff]   ;;  %v1625_v23 = vld [vmem:[#allocation7 + $0xe8] sm:$0xff]   ;;  %s1740_s7 = scalar_lea.vmem %s1739_s23, 512  ;;  %p1741_p5 = scmp.lt.s32.totalorder %s2052_s29, %s1739_s23 }
  0x88   : > { %v1618_v16 = vld [vmem:[#allocation7 + $0x18] sm:$0xff]   ;;  %v1622_v20 = vld [vmem:[#allocation7 + $0x20] sm:$0xff]   ;;  %v1626_v24 = vld [vmem:[#allocation7 + $0x28] sm:$0xff]   ;;  %p1737_p3 = pneg %p1736_p1  ;;  %p1742_p9 = scmp.lt.s32.totalorder %s1740_s7, %s1734_s14 }
  0x89   : > { %709 = vmatpush1.bf16.msra.mxu0 %v1551_v30  ;;  %752 = vmatpush1.bf16.msra.mxu1 %v1552_v31  ;;  %v1619_v17 = vld [vmem:[#allocation7 + $0x98] sm:$0xff]   ;;  %v1623_v21 = vld [vmem:[#allocation7 + $0xa0] sm:$0xff]   ;;  %v1627_v25 = vld [vmem:[#allocation7 + $0xa8] sm:$0xff]  }
  0x8a   : > { %710 = vmatprep.subr.bf16.mxu0 %v1553_v32  ;;  %753 = vmatprep.subr.bf16.mxu1 %v1555_v33  ;;  %v1628_v26 = vld [vmem:[#allocation7 + $0x70] sm:$0xff]   ;;  %v1632_v30 = vld [vmem:[#allocation7 + $0x78] sm:$0xff]   ;;  %p1743_p12 = por %p1742_p9, %p1741_p5 }
  0x8b   : > { %v1629_v27 = vld [vmem:[#allocation7 + $0xf0] sm:$0xff]   ;;  %v1633_v31 = vld [vmem:[#allocation7 + $0xf8] sm:$0xff]  }
  0x8c   : > { %v1630_v28 = vld [vmem:[#allocation7 + $0x30] sm:$0xff]   ;;  %v1634_v32 = vld [vmem:[#allocation7 + $0x38] sm:$0xff]   ;;  %p1744_p2 = pnand %p1743_p12, %p1737_p3 }
  0x8d   : > { %711 = vmatpush1.bf16.msra.mxu0 %v1557_v34  ;;  %754 = vmatpush1.bf16.msra.mxu1 %v1558_v35  ;;  %v1631_v29 = vld [vmem:[#allocation7 + $0xb0] sm:$0xff]   ;;  %v1635_v33 = vld [vmem:[#allocation7 + $0xb8] sm:$0xff]   ;;  %v344_v34 = vlaneseq }
  0x8e   : > { %712 = vmatprep.subr.bf16.mxu0 %v1559_v36  ;;  %755 = vmatprep.subr.bf16.mxu1 %v1561_v37 }
  0x8f   : > { %v345_v35 = vshrl.u32 %v344_v34, 7 }
  0x91   : > { %713 = vmatpush1.bf16.msra.mxu0 %v1563_v38  ;;  %756 = vmatpush1.bf16.msra.mxu1 %v1564_v39  ;;  %v346_v36 = vsub.s32 0, %v345_v35  ;;  %v354_v37 = vsub.s32 2, %v345_v35  ;;  %v342_v38 = vld [vmem:[%s2098_s2] sm:$0xf]  ;;  %v350_v39 = vsub.s32 1, %v345_v35 }
  0x92   : > { %714 = vmatprep.subr.bf16.mxu0 %v1565_v40  ;;  %757 = vmatprep.subr.bf16.mxu1 %v1567_v41  ;;  %v358_v40 = vsub.s32 3, %v345_v35 }
  0x93   : > { %v347_v41 = vrot.slane %v342_v38, %v346_v36 }
  0x95   : > { %715 = vmatpush1.bf16.msra.mxu0 %v1569_v42  ;;  %758 = vmatpush1.bf16.msra.mxu1 %v1570_v43  ;;  %v355_v42 = vrot.slane %v342_v38, %v354_v37  ;;  %v351_v43 = vrot.slane %v342_v38, %v350_v39 }
  0x96   : > { %716 = vmatprep.subr.bf16.mxu0 %v1571_v44  ;;  %759 = vmatprep.subr.bf16.mxu1 %v1573_v45  ;;  %v359_v44 = vrot.slane %v342_v38, %v358_v40 }
  0x99   : > { %717 = vmatpush1.bf16.msra.mxu0 %v1575_v46  ;;  %760 = vmatpush1.bf16.msra.mxu1 %v1576_v47 }
  0x9a   : > { %718 = vmatprep.subr.bf16.mxu0 %v1577_v49  ;;  %761 = vmatprep.subr.bf16.mxu1 %v1579_v50 }
  0x9d   : > { %719 = vmatpush1.bf16.msra.mxu0 %v1581_v51  ;;  %762 = vmatpush1.bf16.msra.mxu1 %v1582_v52 }
  0x9e   : > { %720 = vmatprep.subr.bf16.mxu0 %v1583_v53  ;;  %763 = vmatprep.subr.bf16.mxu1 %v1585_v54 }
  0xa1   : > { %721 = vmatpush1.bf16.msra.mxu0 %v1587_v55  ;;  %764 = vmatpush1.bf16.msra.mxu1 %v1588_v56 }
  0xa2   : > { %722 = vmatprep.subr.bf16.mxu0 %v1589_v57  ;;  %765 = vmatprep.subr.bf16.mxu1 %v1591_v58 }
  0xa5   : > { %723 = vmatpush1.bf16.msra.mxu0 %v1593_v59  ;;  %766 = vmatpush1.bf16.msra.mxu1 %v1594_v60 }
  0xa6   : > { %724 = vmatprep.subr.bf16.mxu0 %v1595_v61  ;;  %767 = vmatprep.subr.bf16.mxu1 %v1597_v62 }
  0xa9   : > { %725 = vmatpush1.bf16.msra.mxu0 %v1599_v63  ;;  %768 = vmatpush1.bf16.msra.mxu1 %v1600_v0 }
  0xaa   : > { %1386 = vmatprep.subr.bf16.mxu0 %v1604_v1  ;;  %1408 = vmatprep.subr.bf16.mxu1 %v1605_v3 }
  0xac   : > { %727 = vmatmul.mubr.bf16.vlgmr.msra.gmra.mrb[0].mxu0 %v1601_v2  ;;  %770 = vmatmul.mubr.bf16.vlgmr.msra.gmra.mrb[0].mxu1 %v1601_v2 }
  0xad   : > { %1387 = vmatpush3.bf16.msra.mxu0 %v1606_v4  ;;  %1409 = vmatpush3.bf16.msra.mxu1 %v1607_v5 }
  0xae   : > { %1388 = vmatprep.subr.bf16.mxu0 %v1608_v6  ;;  %1410 = vmatprep.subr.bf16.mxu1 %v1609_v7 }
  0xb1   : > { %1389 = vmatpush3.bf16.msra.mxu0 %v1610_v8  ;;  %1411 = vmatpush3.bf16.msra.mxu1 %v1611_v9 }
  0xb2   : > { %1390 = vmatprep.subr.bf16.mxu0 %v1612_v10  ;;  %1412 = vmatprep.subr.bf16.mxu1 %v1613_v11  ;;  %v1343_v11 = vld [vmem:[%s2100_s4] ss:$0 sm:$0xff] }
  0xb5   : > { %1391 = vmatpush3.bf16.msra.mxu0 %v1614_v12  ;;  %1413 = vmatpush3.bf16.msra.mxu1 %v1615_v13 }
  0xb6   : > { %1392 = vmatprep.subr.bf16.mxu0 %v1616_v14  ;;  %1414 = vmatprep.subr.bf16.mxu1 %v1617_v15 }
  0xb9   : > { %1393 = vmatpush3.bf16.msra.mxu0 %v1618_v16  ;;  %1415 = vmatpush3.bf16.msra.mxu1 %v1619_v17 }
  0xba   : > { %1394 = vmatprep.subr.bf16.mxu0 %v1620_v18  ;;  %1416 = vmatprep.subr.bf16.mxu1 %v1621_v19 }
  0xbd   : > { %1395 = vmatpush3.bf16.msra.mxu0 %v1622_v20  ;;  %1417 = vmatpush3.bf16.msra.mxu1 %v1623_v21 }
  0xbe   : > { %1396 = vmatprep.subr.bf16.mxu0 %v1624_v22  ;;  %1418 = vmatprep.subr.bf16.mxu1 %v1625_v23 }
  0xc1   : > { %1397 = vmatpush3.bf16.msra.mxu0 %v1626_v24  ;;  %1419 = vmatpush3.bf16.msra.mxu1 %v1627_v25 }
  0xc2   : > { %1398 = vmatprep.subr.bf16.mxu0 %v1628_v26  ;;  %1420 = vmatprep.subr.bf16.mxu1 %v1629_v27 }
  0xc5   : > { %1399 = vmatpush3.bf16.msra.mxu0 %v1630_v28  ;;  %1421 = vmatpush3.bf16.msra.mxu1 %v1631_v29 }
  0xc6   : > { %1400 = vmatprep.subr.bf16.mxu0 %v1632_v30  ;;  %1422 = vmatprep.subr.bf16.mxu1 %v1633_v31 }
  0xc9   : > { %1401 = vmatpush3.bf16.msra.mxu0 %v1634_v32  ;;  %1423 = vmatpush3.bf16.msra.mxu1 %v1635_v33 }
 0x17f   : > { %v728_v45 = vpop.f32.mrb[0].mxu0  ;;  %v771_v46 = vpop.f32.mrb[0].mxu1 }
 0x180   : > { %v729_v47 = vadd.f32 %v728_v45, %v347_v41  ;;  %v772_v48 = vadd.f32 %v771_v46, %v355_v42  ;;  %v730_v49 = vpop.f32.mrb[1].mxu0  ;;  %v773_v50 = vpop.f32.mrb[1].mxu1 }
 0x181   : > { %v731_v51 = vadd.f32 %v730_v49, %v351_v43  ;;  %v774_v52 = vadd.f32 %v773_v50, %v359_v44  ;;  %v732_v53 = vpop.f32.mrb[2].mxu0  ;;  %v775_v54 = vpop.f32.mrb[2].mxu1 }
 0x182   : > { %v782_v55 = vmax.f32 %v772_v48, 0.0  ;;  %v733_v56 = vadd.f32 %v732_v53, %v347_v41  ;;  %v776_v57 = vadd.f32 %v775_v54, %v355_v42  ;;  %v734_v58 = vpop.f32.mrb[3].mxu0  ;;  %v777_v59 = vpop.f32.mrb[3].mxu1  ;;  %v780_v63 = vmax.f32 %v729_v47, 0.0 }
 0x183   : > { %v783_v60 = vmax.f32 %v774_v52, 0.0  ;;  %v735_v61 = vadd.f32 %v734_v58, %v351_v43  ;;  %v778_v62 = vadd.f32 %v777_v59, %v359_v44  ;;  %v781_v2 = vmax.f32 %v731_v51, 0.0 }
 0x184   : > { %v784_v0 = vmax.f32 %v733_v56, 0.0  ;;  %v786_v1 = vmax.f32 %v776_v57, 0.0 }
 0x185   : > { %v785_v3 = vmax.f32 %v735_v61, 0.0  ;;  %v787_v4 = vmax.f32 %v778_v62, 0.0 }
 0x186   : > { %v788_v5 = vpack.c.bf16 %v784_v0, %v780_v63  ;;  %v790_v6 = vpack.c.bf16 %v786_v1, %v782_v55 }
 0x187   : > { %v789_v7 = vpack.c.bf16 %v785_v3, %v781_v2  ;;  %v791_v8 = vpack.c.bf16 %v787_v4, %v783_v60 }
 0x189   : > { %1087 = vmatprep.mubr.bf16.mxu0 %v789_v7  ;;  %1128 = vmatprep.mubr.bf16.mxu1 %v791_v8 }
 0x18a   : > { %1088 = vmatmul.mubr.bf16.vlgmr.msra.gmra.mrb[4].mxu0 %v788_v5  ;;  %1129 = vmatmul.mubr.bf16.vlgmr.msra.gmra.mrb[4].mxu1 %v790_v6 }
 0x25d   : > { %v1402_v9 = vpop.f32.mrb[4].mxu0  ;;  %v1424_v10 = vpop.f32.mrb[4].mxu1 }
 0x25e   : > { %v1403_v12 = vpop.f32.mrb[5].mxu0  ;;  %v1425_v13 = vpop.f32.mrb[5].mxu1 }
 0x25f   : > { %v1404_v14 = vadd.f32 %v1403_v12, %v1402_v9  ;;  %v1426_v15 = vadd.f32 %v1425_v13, %v1424_v10  ;;  %v1405_v16 = vpop.f32.mrb[6].mxu0  ;;  %v1427_v17 = vpop.f32.mrb[6].mxu1 }
 0x260   : > { %v1406_v18 = vpop.f32.mrb[7].mxu0  ;;  %v1428_v19 = vpop.f32.mrb[7].mxu1 }
 0x261   : > { %v1090_v20 = vadd.f32 %v1404_v14, %v1343_v11  ;;  %v1407_v21 = vadd.f32 %v1406_v18, %v1405_v16  ;;  %v1429_v22 = vadd.f32 %v1428_v19, %v1427_v17 }
 0x263   : > { %v1131_v23 = vadd.f32 %v1426_v15, %v1090_v20  ;;  %v1093_v24 = vadd.f32 %v1407_v21, %v1343_v11 }
 0x265   : > { %v1376_v25 = vmul.f32 -1.442695, %v1131_v23  ;;  %v1134_v26 = vadd.f32 %v1429_v22, %v1093_v24 }
 0x267   : > { %1636 = vpow2.f32 %v1376_v25  ;;  %v1377_v27 = vmul.f32 -1.442695, %v1134_v26 }
 0x269   : > { %1638 = vpow2.f32 %v1377_v27 }
 0x271   : > { %v1637_v28 = vpop.eup %1636 }
 0x272   : > { %v1143_v29 = vadd.f32 1.0, %v1637_v28 }
 0x273   : > { %v1639_v30 = vpop.eup %1638 }
 0x274   : > { %1640 = vrcp.f32 %v1143_v29  ;;  %v1144_v31 = vadd.f32 1.0, %v1639_v30 }
 0x276   : > { %1642 = vrcp.f32 %v1144_v31 }
 0x27e   : > { %v1641_v32 = vpop.eup %1640 }
 0x27f   : > { %v1149_v33 = vadd.f32 1e-09, %v1641_v32 }
 0x280   : > { %v1643_v34 = vpop.eup %1642 }
 0x281   : > { %1644 = vlog2.f32 %v1149_v33  ;;  %v1150_v35 = vadd.f32 1e-09, %v1643_v34 }
 0x283   : > { %1646 = vlog2.f32 %v1150_v35 }
 0x28b   : > { %v1645_v36 = vpop.eup %1644 }
 0x28c   : > { %v1152_v37 = vmul.f32 0.6931472, %v1645_v36 }
 0x28d   : > { %v1647_v38 = vpop.eup %1646 }
 0x28e   : > { %v1154_v39 = vmul.f32 0.6931472, %v1647_v38  ;;  %1155 = vst [vmem:[%s272_s13] sm:$0xff] %v1152_v37 }
 0x290   : > { %1156 = vst [vmem:[%s272_s13 + $0x8] sm:$0xff] %v1154_v39 }
 0x291   : > { %1747 = shalt.err (!%p1744_p2)
}
 0x292   : > { %s1748_s6 = scalar_lea.hbm %s2050_s11, 256  ;;  %s1752_s10 = scalar_lea.hbm %s2101_s5, 512 }
 0x293   : > { %p1749_p13 = scmp.ne.s32.totalorder %s2050_s11, %s1748_s6  ;;  %p1753_p4 = scmp.lt.u32.totalorder %s2050_s11, %s2101_s5 }
 0x294   : > { %p1754_p7 = scmp.lt.u32.totalorder %s1752_s10, %s1748_s6  ;;  %p1756_p11 = scmp.lt.u32.totalorder %s1748_s6, %s2050_s11 }
 0x295   : > { %p1750_p6 = pnand %p1749_p13, %p2115_p0 }
 0x296   : > { %p1755_p8 = por %p1754_p7, %p1753_p4 }
 0x297   : > { %p1751_p10 = pneg %p1750_p6 }
 0x298   : > { %p1757_p1 = por %p1756_p11, %p1755_p8 }
 0x29a   : > { %p1758_p3 = pnand %p1757_p1, %p1751_p10 }
 0x29c   : > { %1761 = shalt.err (!%p1758_p3)
}
 0x29d   : > { %s1816_s13 = smov 128   ;;  %s1817_s8 = smov 8  }
 0x29e   : > { %1440 = dma.vmem_to_hbm [thread:$0]  (%p2115_p0), %s2052_s29, 256, %s2050_s11, %s1158_s22, %s1816_s13, %s1816_s13, %s1817_s8  }
 0x29f PF: > { %s1186_s9 = sand.u32 1, %s1792_s18   ;;  %p2116_p5 = scmp.ne.s32.totalorder %s2106_s25, 0 }
 0x2a0   : > { %p2117_p9 = scmp.ge.s32.totalorder %s1804_s21, 2  ;;  %s1187_s14 = scalar_lea.sflag [#allocation4], %s1186_s9 }
 0x2a2   : > { %p1454_p12 = pnand %p2117_p9, %p2116_p5 }
 0x2a4   : > { %1787 = dma.done.wait (!%p1454_p12), %s1187_s14, 256  }
 0x2a5   : > { %1789 = vsyncadd (!%p1454_p12), %s1187_s14, 4294967040  ;;  %p19_p2 = scmp.ge.s32.totalorder %s1958_s16, 4   ;;  %s2118_s18 = smov %s1796_s19 }
 0x2a6   : > { %s2119_s19 = smov %s1800_s20  ;;  %s2120_s20 = smov %s1967_s27 }
 0x2a7   : > { %s2121_s21 = smov %s1958_s16  ;;  %21 = sbr.rel (!%p19_p2) target bundleno = 6 (0x6), region = 93 }
 0x2ae   :  { %1192 = vsyncpa [#allocation3], 1 }
 0x2af   :  { %1194 = vsyncpa [#allocation3 + $0x1], 1 }
 0x2b0   :  { %1195 = vsyncpa [#allocation6], 1 }
 0x2b1   :  { %1196 = vsyncpa [#allocation4], 1 }
 0x2b2   :  { %1198 = vsyncpa [#allocation4 + $0x1], 1 }

</bundles_post_ra>
